<compile_context>
chip_gen: v5e
topology: v5e:2x2
jax: 0.10.0
libtpu: 0.0.40
codegen_flags: <defaults>
</compile_context>

<pallas_src>
import jax
import jax.numpy as jnp
from jax import lax
from jax.experimental import pallas as pl
from jax.experimental.pallas import tpu as pltpu

# ---------------- problem configuration (consistent with the module) ----------
INPUT_DIM = 32
HIDDEN_DIM = 32
NUM_LAYERS = 2
DRUG_NUM = 8
TARGET_NUM = 8
N_NODES = DRUG_NUM + TARGET_NUM          # H has drug rows first, then target rows
EPS = 0.0                                # GINLayer default (train_eps=False)

N_W_SLOTS = 2 * NUM_LAYERS + 2           # emb_W + (lin1_W, lin2_W) per layer + train_W
N_B_SLOTS = 2 * NUM_LAYERS + 1           # emb_b + (lin1_b, lin2_b) per layer


def _gin_autoencoder_kernel(x_ref, adj_ref, w_ref, b_ref, out_ref):
    # x_ref  : [1, N, F]    one graph per grid step
    # adj_ref: [1, N, N]
    # w_ref  : [2L+2, H, H] coalesced weight slab
    # b_ref  : [2L+1, H]    coalesced bias slab
    # out_ref: [1, DRUG_NUM, TARGET_NUM]
    x = x_ref[0]        # [N, F] (already f32; no cast)
    adj = adj_ref[0]    # [N, N]

    # embedding_layer: Linear(input_dim -> hidden_dim)
    h = jnp.dot(x, w_ref[0], preferred_element_type=jnp.float32) + b_ref[0:1, :]

    # GIN layers: h = h + (1 + eps) * adj @ h ; h = Linear -> ReLU -> Linear
    for l in range(NUM_LAYERS):   # static unroll (num_layers is compile-time)
        h = h + (1.0 + EPS) * jnp.dot(adj, h, preferred_element_type=jnp.float32)
        h = (jnp.dot(h, w_ref[1 + 2 * l], preferred_element_type=jnp.float32)
             + b_ref[1 + 2 * l:2 + 2 * l, :])
        h = jnp.maximum(h, 0.0)
        h = (jnp.dot(h, w_ref[2 + 2 * l], preferred_element_type=jnp.float32)
             + b_ref[2 + 2 * l:3 + 2 * l, :])

    # final ReLU
    h = jnp.maximum(h, 0.0)

    # Decoder: HR @ train_W @ HD^T, with the second contraction over HD's
    # feature axis (no materialized transpose).
    hr = h[0:DRUG_NUM, :]
    hd = h[DRUG_NUM:DRUG_NUM + TARGET_NUM, :]
    supp1 = jnp.dot(hr, w_ref[N_W_SLOTS - 1], preferred_element_type=jnp.float32)
    dec = lax.dot_general(supp1, hd,
                          dimension_numbers=(((1,), (1,)), ((), ())),
                          preferred_element_type=jnp.float32)
    out_ref[0] = dec


@jax.jit
def gin_autoencoder_forward(x, adj, w_slab, b_slab):
    B, N, F = x.shape
    flops_per_graph = (
        2 * N * F * HIDDEN_DIM
        + NUM_LAYERS * (2 * N * N * HIDDEN_DIM + 2 * (2 * N * HIDDEN_DIM * HIDDEN_DIM))
        + 2 * DRUG_NUM * HIDDEN_DIM * HIDDEN_DIM
        + 2 * DRUG_NUM * TARGET_NUM * HIDDEN_DIM
    )
    bytes_accessed = 4 * (x.size + adj.size + w_slab.size + b_slab.size
                          + B * DRUG_NUM * TARGET_NUM)
    return pl.pallas_call(
        _gin_autoencoder_kernel,
        out_shape=jax.ShapeDtypeStruct((B, DRUG_NUM, TARGET_NUM), jnp.float32),
        grid=(B,),
        in_specs=[
            pl.BlockSpec((1, N, F), lambda b: (b, 0, 0)),
            pl.BlockSpec((1, N, N), lambda b: (b, 0, 0)),
            pl.BlockSpec((N_W_SLOTS, HIDDEN_DIM, HIDDEN_DIM), lambda b: (0, 0, 0)),
            pl.BlockSpec((N_B_SLOTS, HIDDEN_DIM), lambda b: (0, 0)),
        ],
        out_specs=pl.BlockSpec((1, DRUG_NUM, TARGET_NUM), lambda b: (b, 0, 0)),
        compiler_params=pltpu.CompilerParams(dimension_semantics=("parallel",)),
        cost_estimate=pl.CostEstimate(
            flops=int(B * flops_per_graph),
            transcendentals=0,
            bytes_accessed=int(bytes_accessed),
        ),
    )(x, adj, w_slab, b_slab)


if __name__ == "__main__":
    key = jax.random.PRNGKey(0)
    ks = jax.random.split(key, 12)

    B = 4  # batch of graphs

    # inputs
    x = jax.random.normal(ks[0], (B, N_NODES, INPUT_DIM), dtype=jnp.float32)
    adj = (jax.random.uniform(ks[1], (B, N_NODES, N_NODES)) > 0.5).astype(jnp.float32)
    adj = jnp.maximum(adj, jnp.swapaxes(adj, -1, -2))   # symmetric adjacency

    # parameters. PyTorch nn.Linear stores W as [out, in]; build that way and
    # transpose here (wrapper glue) so the kernel does x @ W.
    def linear_params(k, in_dim, out_dim):
        kw, kb = jax.random.split(k)
        w_torch = jax.random.normal(kw, (out_dim, in_dim), dtype=jnp.float32) * 0.1
        b = jax.random.normal(kb, (out_dim,), dtype=jnp.float32) * 0.1
        return w_torch.T, b  # [in, out], [out]

    w_emb, b_emb = linear_params(ks[2], INPUT_DIM, HIDDEN_DIM)

    w1_list, b1_list, w2_list, b2_list = [], [], [], []
    for l in range(NUM_LAYERS):
        k1, k2 = jax.random.split(ks[3 + l])
        w1, b1 = linear_params(k1, HIDDEN_DIM, HIDDEN_DIM)
        w2, b2 = linear_params(k2, HIDDEN_DIM, HIDDEN_DIM)
        w1_list.append(w1); b1_list.append(b1)
        w2_list.append(w2); b2_list.append(b2)

    train_w = jax.random.normal(ks[8], (HIDDEN_DIM, HIDDEN_DIM), dtype=jnp.float32) * 0.1

    # coalesce parameters into two slabs (requires INPUT_DIM == HIDDEN_DIM)
    assert INPUT_DIM == HIDDEN_DIM
    w_slots = [w_emb]
    b_slots = [b_emb]
    for l in range(NUM_LAYERS):
        w_slots += [w1_list[l], w2_list[l]]
        b_slots += [b1_list[l], b2_list[l]]
    w_slots.append(train_w)
    w_slab = jnp.stack(w_slots)     # [2L+2, H, H]
    b_slab = jnp.stack(b_slots)     # [2L+1, H]

    out = gin_autoencoder_forward(x, adj, w_slab, b_slab)
    out = jax.block_until_ready(out)

    # pure-JAX reference (per graph, vmapped over batch)
    def ref_single(xg, ag):
        h = xg @ w_emb + b_emb
        for l in range(NUM_LAYERS):
            h = h + (1.0 + EPS) * (ag @ h)
            h = jnp.maximum(h @ w1_list[l] + b1_list[l], 0.0)
            h = h @ w2_list[l] + b2_list[l]
        h = jnp.maximum(h, 0.0)
        hr = h[:DRUG_NUM]
        hd = h[DRUG_NUM:DRUG_NUM + TARGET_NUM]
        return (hr @ train_w) @ hd.T

    ref = jax.vmap(ref_single)(x, adj)

    assert out.shape == (B, DRUG_NUM, TARGET_NUM)
    assert jnp.allclose(out, ref, rtol=1e-4, atol=1e-4), float(jnp.max(jnp.abs(out - ref)))

    print("KERNEL_OK")
</pallas_src>

<mosaic_0001>
module attributes {stable_mosaic.version = 11 : i64} {
  func.func @_gin_autoencoder_kernel(%arg0: i32, %arg1: memref<1x16x32xf32, #tpu.memory_space<vmem>>, %arg2: memref<1x16x16xf32, #tpu.memory_space<vmem>>, %arg3: memref<6x32x32xf32, #tpu.memory_space<vmem>>, %arg4: memref<5x32xf32, #tpu.memory_space<vmem>>, %arg5: memref<1x8x8xf32, #tpu.memory_space<vmem>>) attributes {dimension_semantics = [#tpu.dimension_semantics<parallel>], iteration_bounds = array<i64: 4>, scalar_prefetch = 0 : i64, scratch_operands = 0 : i64, tpu.core_type = #tpu.core_type<tc>, window_params = [{transform_indices = @transform_0, window_bounds = array<i64: 1, 16, 32>}, {transform_indices = @transform_1, window_bounds = array<i64: 1, 16, 16>}, {pipeline_mode = #tpu.pipeline_mode<synchronous>, transform_indices = @transform_2, window_bounds = array<i64: 6, 32, 32>}, {pipeline_mode = #tpu.pipeline_mode<synchronous>, transform_indices = @transform_3, window_bounds = array<i64: 5, 32>}, {transform_indices = @transform_4, window_bounds = array<i64: 1, 8, 8>}]} {
    %c0 = arith.constant 0 : index
    %c0_0 = arith.constant 0 : index
    %c0_1 = arith.constant 0 : index
    %0 = vector.load %arg1[%c0, %c0_0, %c0_1] : memref<1x16x32xf32, #tpu.memory_space<vmem>>, vector<1x16x32xf32>
    %1 = vector.shape_cast %0 : vector<1x16x32xf32> to vector<16x32xf32>
    %c0_2 = arith.constant 0 : index
    %c0_3 = arith.constant 0 : index
    %c0_4 = arith.constant 0 : index
    %2 = vector.load %arg2[%c0_2, %c0_3, %c0_4] : memref<1x16x16xf32, #tpu.memory_space<vmem>>, vector<1x16x16xf32>
    %3 = vector.shape_cast %2 : vector<1x16x16xf32> to vector<16x16xf32>
    %c0_5 = arith.constant 0 : index
    %c0_6 = arith.constant 0 : index
    %c0_7 = arith.constant 0 : index
    %4 = vector.load %arg3[%c0_5, %c0_6, %c0_7] : memref<6x32x32xf32, #tpu.memory_space<vmem>>, vector<1x32x32xf32>
    %5 = vector.shape_cast %4 : vector<1x32x32xf32> to vector<32x32xf32>
    %cst = arith.constant dense<0.000000e+00> : vector<16x32xf32>
    %6 = tpu.matmul %1, %5, %cst {dimension_numbers = #tpu.dot_dimension_numbers<[1], [0], [0], [1], [0, 0, 1, 1], [], []>} : vector<16x32xf32>, vector<32x32xf32>, vector<16x32xf32> -> vector<16x32xf32>
    %c0_8 = arith.constant 0 : index
    %c0_9 = arith.constant 0 : index
    %7 = vector.load %arg4[%c0_8, %c0_9] : memref<5x32xf32, #tpu.memory_space<vmem>>, vector<1x32xf32>
    %8 = vector.broadcast %7 : vector<1x32xf32> to vector<16x32xf32>
    %9 = arith.addf %6, %8 : vector<16x32xf32>
    %cst_10 = arith.constant dense<0.000000e+00> : vector<16x32xf32>
    %10 = tpu.matmul %3, %9, %cst_10 {dimension_numbers = #tpu.dot_dimension_numbers<[1], [0], [0], [1], [0, 0, 1, 1], [], []>} : vector<16x16xf32>, vector<16x32xf32>, vector<16x32xf32> -> vector<16x32xf32>
    %cst_11 = arith.constant 1.000000e+00 : f32
    %11 = vector.broadcast %cst_11 : f32 to vector<16x32xf32>
    %12 = arith.mulf %11, %10 : vector<16x32xf32>
    %13 = arith.addf %9, %12 : vector<16x32xf32>
    %c1 = arith.constant 1 : index
    %c0_12 = arith.constant 0 : index
    %c0_13 = arith.constant 0 : index
    %14 = vector.load %arg3[%c1, %c0_12, %c0_13] : memref<6x32x32xf32, #tpu.memory_space<vmem>>, vector<1x32x32xf32>
    %15 = vector.shape_cast %14 : vector<1x32x32xf32> to vector<32x32xf32>
    %cst_14 = arith.constant dense<0.000000e+00> : vector<16x32xf32>
    %16 = tpu.matmul %13, %15, %cst_14 {dimension_numbers = #tpu.dot_dimension_numbers<[1], [0], [0], [1], [0, 0, 1, 1], [], []>} : vector<16x32xf32>, vector<32x32xf32>, vector<16x32xf32> -> vector<16x32xf32>
    %c1_15 = arith.constant 1 : index
    %c0_16 = arith.constant 0 : index
    %17 = vector.load %arg4[%c1_15, %c0_16] : memref<5x32xf32, #tpu.memory_space<vmem>>, vector<1x32xf32>
    %18 = vector.broadcast %17 : vector<1x32xf32> to vector<16x32xf32>
    %19 = arith.addf %16, %18 : vector<16x32xf32>
    %cst_17 = arith.constant 0.000000e+00 : f32
    %20 = vector.broadcast %cst_17 : f32 to vector<16x32xf32>
    %21 = arith.maximumf %19, %20 : vector<16x32xf32>
    %c2 = arith.constant 2 : index
    %c0_18 = arith.constant 0 : index
    %c0_19 = arith.constant 0 : index
    %22 = vector.load %arg3[%c2, %c0_18, %c0_19] : memref<6x32x32xf32, #tpu.memory_space<vmem>>, vector<1x32x32xf32>
    %23 = vector.shape_cast %22 : vector<1x32x32xf32> to vector<32x32xf32>
    %cst_20 = arith.constant dense<0.000000e+00> : vector<16x32xf32>
    %24 = tpu.matmul %21, %23, %cst_20 {dimension_numbers = #tpu.dot_dimension_numbers<[1], [0], [0], [1], [0, 0, 1, 1], [], []>} : vector<16x32xf32>, vector<32x32xf32>, vector<16x32xf32> -> vector<16x32xf32>
    %c2_21 = arith.constant 2 : index
    %c0_22 = arith.constant 0 : index
    %25 = vector.load %arg4[%c2_21, %c0_22] : memref<5x32xf32, #tpu.memory_space<vmem>>, vector<1x32xf32>
    %26 = vector.broadcast %25 : vector<1x32xf32> to vector<16x32xf32>
    %27 = arith.addf %24, %26 : vector<16x32xf32>
    %cst_23 = arith.constant dense<0.000000e+00> : vector<16x32xf32>
    %28 = tpu.matmul %3, %27, %cst_23 {dimension_numbers = #tpu.dot_dimension_numbers<[1], [0], [0], [1], [0, 0, 1, 1], [], []>} : vector<16x16xf32>, vector<16x32xf32>, vector<16x32xf32> -> vector<16x32xf32>
    %cst_24 = arith.constant 1.000000e+00 : f32
    %29 = vector.broadcast %cst_24 : f32 to vector<16x32xf32>
    %30 = arith.mulf %29, %28 : vector<16x32xf32>
    %31 = arith.addf %27, %30 : vector<16x32xf32>
    %c3 = arith.constant 3 : index
    %c0_25 = arith.constant 0 : index
    %c0_26 = arith.constant 0 : index
    %32 = vector.load %arg3[%c3, %c0_25, %c0_26] : memref<6x32x32xf32, #tpu.memory_space<vmem>>, vector<1x32x32xf32>
    %33 = vector.shape_cast %32 : vector<1x32x32xf32> to vector<32x32xf32>
    %cst_27 = arith.constant dense<0.000000e+00> : vector<16x32xf32>
    %34 = tpu.matmul %31, %33, %cst_27 {dimension_numbers = #tpu.dot_dimension_numbers<[1], [0], [0], [1], [0, 0, 1, 1], [], []>} : vector<16x32xf32>, vector<32x32xf32>, vector<16x32xf32> -> vector<16x32xf32>
    %c3_28 = arith.constant 3 : index
    %c0_29 = arith.constant 0 : index
    %35 = vector.load %arg4[%c3_28, %c0_29] : memref<5x32xf32, #tpu.memory_space<vmem>>, vector<1x32xf32>
    %36 = vector.broadcast %35 : vector<1x32xf32> to vector<16x32xf32>
    %37 = arith.addf %34, %36 : vector<16x32xf32>
    %cst_30 = arith.constant 0.000000e+00 : f32
    %38 = vector.broadcast %cst_30 : f32 to vector<16x32xf32>
    %39 = arith.maximumf %37, %38 : vector<16x32xf32>
    %c4 = arith.constant 4 : index
    %c0_31 = arith.constant 0 : index
    %c0_32 = arith.constant 0 : index
    %40 = vector.load %arg3[%c4, %c0_31, %c0_32] : memref<6x32x32xf32, #tpu.memory_space<vmem>>, vector<1x32x32xf32>
    %41 = vector.shape_cast %40 : vector<1x32x32xf32> to vector<32x32xf32>
    %cst_33 = arith.constant dense<0.000000e+00> : vector<16x32xf32>
    %42 = tpu.matmul %39, %41, %cst_33 {dimension_numbers = #tpu.dot_dimension_numbers<[1], [0], [0], [1], [0, 0, 1, 1], [], []>} : vector<16x32xf32>, vector<32x32xf32>, vector<16x32xf32> -> vector<16x32xf32>
    %c4_34 = arith.constant 4 : index
    %c0_35 = arith.constant 0 : index
    %43 = vector.load %arg4[%c4_34, %c0_35] : memref<5x32xf32, #tpu.memory_space<vmem>>, vector<1x32xf32>
    %44 = vector.broadcast %43 : vector<1x32xf32> to vector<16x32xf32>
    %45 = arith.addf %42, %44 : vector<16x32xf32>
    %cst_36 = arith.constant 0.000000e+00 : f32
    %46 = vector.broadcast %cst_36 : f32 to vector<16x32xf32>
    %47 = arith.maximumf %45, %46 : vector<16x32xf32>
    %48 = vector.extract_strided_slice %47 {offsets = [0, 0], sizes = [8, 32], strides = [1, 1]} : vector<16x32xf32> to vector<8x32xf32>
    %49 = vector.extract_strided_slice %47 {offsets = [8, 0], sizes = [8, 32], strides = [1, 1]} : vector<16x32xf32> to vector<8x32xf32>
    %c5 = arith.constant 5 : index
    %c0_37 = arith.constant 0 : index
    %c0_38 = arith.constant 0 : index
    %50 = vector.load %arg3[%c5, %c0_37, %c0_38] : memref<6x32x32xf32, #tpu.memory_space<vmem>>, vector<1x32x32xf32>
    %51 = vector.shape_cast %50 : vector<1x32x32xf32> to vector<32x32xf32>
    %cst_39 = arith.constant dense<0.000000e+00> : vector<8x32xf32>
    %52 = tpu.matmul %48, %51, %cst_39 {dimension_numbers = #tpu.dot_dimension_numbers<[1], [0], [0], [1], [0, 0, 1, 1], [], []>} : vector<8x32xf32>, vector<32x32xf32>, vector<8x32xf32> -> vector<8x32xf32>
    %cst_40 = arith.constant dense<0.000000e+00> : vector<8x8xf32>
    %53 = tpu.matmul %52, %49, %cst_40 {dimension_numbers = #tpu.dot_dimension_numbers<[1], [1], [0], [0], [0, 0, 1, 0], [], []>} : vector<8x32xf32>, vector<8x32xf32>, vector<8x8xf32> -> vector<8x8xf32>
    %c0_41 = arith.constant 0 : index
    %c0_42 = arith.constant 0 : index
    %c0_43 = arith.constant 0 : index
    %54 = vector.load %arg5[%c0_41, %c0_42, %c0_43] : memref<1x8x8xf32, #tpu.memory_space<vmem>>, vector<1x8x8xf32>
    %55 = vector.shape_cast %54 : vector<1x8x8xf32> to vector<8x8xf32>
    %56 = vector.shape_cast %53 : vector<8x8xf32> to vector<1x8x8xf32>
    tpu.vector_store %arg5[%c0_41, %c0_42, %c0_43], %56 {strides = array<i32>} : memref<1x8x8xf32, #tpu.memory_space<vmem>>, vector<1x8x8xf32>,
    return
  }
  func.func @transform_0(%arg0: i32) -> (i32, i32, i32) {
    %c0_i32 = arith.constant 0 : i32
    %c0_i32_0 = arith.constant 0 : i32
    %c0_i32_1 = arith.constant 0 : i32
    return %arg0, %c0_i32, %c0_i32_0 : i32, i32, i32
  }
  func.func @transform_1(%arg0: i32) -> (i32, i32, i32) {
    %c0_i32 = arith.constant 0 : i32
    %c0_i32_0 = arith.constant 0 : i32
    %c0_i32_1 = arith.constant 0 : i32
    return %arg0, %c0_i32, %c0_i32_0 : i32, i32, i32
  }
  func.func @transform_2(%arg0: i32) -> (i32, i32, i32) {
    %c0_i32 = arith.constant 0 : i32
    %c0_i32_0 = arith.constant 0 : i32
    %c0_i32_1 = arith.constant 0 : i32
    %c0_i32_2 = arith.constant 0 : i32
    return %c0_i32, %c0_i32_0, %c0_i32_1 : i32, i32, i32
  }
  func.func @transform_3(%arg0: i32) -> (i32, i32) {
    %c0_i32 = arith.constant 0 : i32
    %c0_i32_0 = arith.constant 0 : i32
    %c0_i32_1 = arith.constant 0 : i32
    return %c0_i32, %c0_i32_0 : i32, i32
  }
  func.func @transform_4(%arg0: i32) -> (i32, i32, i32) {
    %c0_i32 = arith.constant 0 : i32
    %c0_i32_0 = arith.constant 0 : i32
    %c0_i32_1 = arith.constant 0 : i32
    return %arg0, %c0_i32, %c0_i32_0 : i32, i32, i32
  }
}

</mosaic_0001>

<bundles_post_ra>
// kernel: gin_autoencoder_forward.1
= control target key start
LH: loop header
LB: loop body
LE: loop exit
PB: predicated region body
PF: predicated region fallthrough
CT: control target
= control target key end

     0   :  { %s1271_s0 = inlined_call_operand.hbm [shape: f32[4,16,32], index: 0, kind: input, shape index: {}]   ;;  %s1272_s1 = inlined_call_operand.hbm [shape: f32[4,16,16], index: 1, kind: input, shape index: {}]   ;;  %s1273_s2 = inlined_call_operand.hbm [shape: f32[6,32,32], index: 2, kind: input, shape index: {}]   ;;  %s1274_s3 = inlined_call_operand.hbm [shape: f32[5,32], index: 3, kind: input, shape index: {}]   ;;  %s1275_s4 = inlined_call_operand.hbm [shape: f32[4,8,8], index: 4, kind: output, shape index: {}]  }
   0x1   :  { %1280 = sst [smem:[#allocation16_spill]] %s1271_s0 }
   0x2   :  { %1281 = sst [smem:[#allocation17_spill]] %s1273_s2 }
   0x3   :  { %1282 = sst [smem:[#allocation18_spill]] %s1274_s3 }
   0x4   :  { %9 = vsyncpa [#allocation3], 0 }
   0x5   :  { %11 = vsyncpa [#allocation3 + $0x1], 0 }
   0x6   :  { %12 = vsyncpa [#allocation6], 0 }
   0x7   :  { %14 = vsyncpa [#allocation6 + $0x1], 0 }
   0x8   :  { %15 = vsyncpa [#allocation9], 0 }
   0x9   :  { %16 = vsyncpa [#allocation4], 0 }
   0xa   :  { %18 = vsyncpa [#allocation4 + $0x1], 0  ;;  %s1070_s15 = smov 0   ;;  %s1072_s16 = smov 0  }
   0xb   :  { %s1074_s17 = smov 0   ;;  %s1076_s18 = smov 0  }
   0xc LB: > { %s1091_s19 = sadd.s32 4294967295, %s1039_s18   ;;  %s722_s20 = sadd.s32 4294967294, %s1039_s18   ;;  %s1039_s18 = sphi %s1076_s18, %s1296_s18   ;;  %s1035_s17 = sphi %s1074_s17, %s1295_s17   ;;  %s1031_s16 = sphi %s1072_s16, %s1294_s16   ;;  %s1027_s15 = sphi %s1070_s15, %s1293_s15  }
   0xd   : > { %p44_p0 = scmp.ne.s32.totalorder %s1031_s16, %s1027_s15  ;;  %p45_p1 = scmp.eq.s32.totalorder %s1091_s19, 0 }
   0xe   : > { %p136_p2 = scmp.eq.s32.totalorder %s1091_s19, 3  ;;  %p142_p3 = scmp.eq.s32.totalorder %s722_s20, 3 }
   0xf   : > { %p1100_p4 = por %p45_p1, %p44_p0  ;;  %p723_p5 = scmp.ge.s32.totalorder %s1039_s18, 1 }
  0x10   : > { %p1105_p6 = por %p142_p3, %p44_p0  ;;  %p149_p7 = scmp.lt.s32.totalorder %s1039_s18, 5 }
  0x11   : > { %s1285_s2 = sld [smem:[#allocation17_spill]]  ;;  %s1041_s27 = smov [#allocation7]  }
  0x12   : > { %p1113_p8 = pnand %p723_p5, %p149_p7  ;;  %s162_s28 = sshll.u32 %s1041_s27, 4  ;;  %s163_s28 = int_to_ptr.vmem [resolvable:$true] %s162_s28 }
  0x13   : > { %s1287_s3 = sld [smem:[#allocation18_spill]]  ;;  %s1276_s6 = smov 128  }
  0x14   : > { %p776_p9 = pneg %p1113_p8  ;;  %s1278_s7 = smov 8  }
  0x15   : > { %s1044_s8 = smov [#allocation8]   ;;  %s1128_s10 = sadd.s32 1, %s1039_s18  }
  0x16   : > { %p777_p10 = pnand %p776_p9, %p45_p1  ;;  %s177_s9 = sshll.u32 %s1044_s8, 4  ;;  %s178_s9 = int_to_ptr.vmem [resolvable:$true] %s177_s9 }
  0x17   : > { %s160_s25 = sshll.u32 %s1285_s2, 4  ;;  %s31_s11 = sadd.s32 1, %s1035_s17  ;;  %s161_s25 = int_to_ptr.hbm [resolvable:$true] %s160_s25 }
  0x18   : > { %779 = dma.hbm_to_vmem [thread:$0]  (!%p777_p10), %s161_s25, 3072, %s163_s28, [#allocation6], %s1276_s6, %s1276_s6, %s1278_s7  }
  0x19   : > { %s175_s5 = sshll.u32 %s1287_s3, 4  ;;  %s28_s12 = ssub.s32 %s1039_s18, %s1128_s10  ;;  %s176_s5 = int_to_ptr.hbm [resolvable:$true] %s175_s5 }
  0x1a   : > { %782 = dma.hbm_to_vmem [thread:$0]  (!%p777_p10), %s176_s5, 128, %s178_s9, [#allocation9]  }
  0x1b   : > { %p38_p11 = scmp.ne.s32.totalorder %s1035_s17, %s1031_s16  ;;  %p29_p12 = scmp.eq.s32.totalorder %s28_s12, 0 }
  0x1c   : > { %p39_p13 = scmp.eq.s32.totalorder %s1039_s18, 0  ;;  %p796_p3 = scmp.lt.s32.totalorder %s1039_s18, 4 }
  0x1d   : > { %p1138_p0 = por %p136_p2, %p38_p11  ;;  %s188_s20 = sand.u32 1, %s1035_s17  }
  0x1e   : > { %s1144_s14 = scalar_select %p29_p12, %s1035_s17, %s31_s11  }
  0x1f   : > { %p40_p5 = por %p39_p13, %p38_p11  ;;  %s1147_s23 = sshll.u32 %s188_s20, 4 }
  0x20   : > { %s760_s24 = sshll.u32 %s1039_s18, 4  ;;  %s1289_s0 = sld [smem:[#allocation16_spill]] }
  0x21   : > { %s192_s29 = scalar_lea.vmem [#allocation2], %s1147_s23  ;;  %p1154_p2 = pnand %p796_p3, %p40_p5 }
  0x22   : > { %s200_s30 = sshll.u32 %s192_s29, 4  ;;  %s219_s12 = scalar_lea.hbm %s1272_s1, %s760_s24  ;;  %s201_s30 = int_to_ptr.vmem [resolvable:$true] %s200_s30 }
  0x23   : > { %s220_s6 = sshll.u32 %s219_s12, 4  ;;  %s189_s7 = scalar_lea.sflag [#allocation3], %s188_s20  ;;  %s221_s6 = int_to_ptr.hbm [resolvable:$true] %s220_s6 }
  0x24   : > { %p905_p9 = pneg %p1154_p2 }
  0x26   : > { %s197_s28 = scalar_lea.hbm %s1289_s0, %s760_s24  ;;  %s908_s29 = scalar_lea.hbm %s1289_s0, 64 }
  0x27   : > { %s198_s5 = sshll.u32 %s197_s28, 4  ;;  %s199_s5 = int_to_ptr.hbm [resolvable:$true] %s198_s5 }
  0x28   : > { %s901_s2 = sshra.s32 %s199_s5, 4  ;;  %s902_s2 = int_to_ptr.hbm [resolvable:$true] %s901_s2 }
  0x29   : > { %s903_s25 = scalar_lea.hbm %s902_s2, 16  ;;  %p909_p12 = scmp.lt.s32.totalorder %s902_s2, %s1289_s0 }
  0x2a   : > { %p904_p7 = scmp.ne.s32.totalorder %s902_s2, %s903_s25  ;;  %p910_p13 = scmp.lt.s32.totalorder %s908_s29, %s903_s25 }
  0x2c   : > { %p906_p10 = pnand %p905_p9, %p904_p7  ;;  %p911_p3 = por %p910_p13, %p909_p12 }
  0x2e   : > { %p907_p11 = pneg %p906_p10 }
  0x30   : > { %p912_p5 = pnand %p911_p3, %p907_p11 }
  0x32   : > { %915 = shalt.err (!%p912_p5)
}
  0x33   : > { %s1291_s20 = smov 8   ;;  %s1292_s24 = smov 128  }
  0x34   : > { %786 = dma.hbm_to_vmem [thread:$0]  (!%p1154_p2), %s199_s5, 256, %s201_s30, %s189_s7, %s1292_s24, %s1292_s24, %s1291_s20  }
  0x35   : > { %s214_s12 = scalar_lea.vmem [#allocation5], %s1147_s23  ;;  %s210_s28 = sand.u32 1, %s1039_s18  }
  0x36   : > { %s222_s27 = sshll.u32 %s214_s12, 4  ;;  %s211_s9 = scalar_lea.sflag [#allocation6], %s210_s28  ;;  %s223_s27 = int_to_ptr.vmem [resolvable:$true] %s222_s27 }
  0x37   : > { %s931_s2 = sshra.s32 %s221_s6, 4  ;;  %s938_s0 = scalar_lea.hbm %s1272_s1, 64  ;;  %s932_s2 = int_to_ptr.hbm [resolvable:$true] %s931_s2 }
  0x38   : > { %s933_s25 = scalar_lea.hbm %s932_s2, 16  ;;  %p939_p12 = scmp.lt.s32.totalorder %s932_s2, %s1272_s1 }
  0x39   : > { %p934_p7 = scmp.ne.s32.totalorder %s932_s2, %s933_s25  ;;  %p940_p13 = scmp.lt.s32.totalorder %s938_s0, %s933_s25 }
  0x3b   : > { %p936_p10 = pnand %p934_p7, %p905_p9  ;;  %p941_p3 = por %p940_p13, %p939_p12 }
  0x3d   : > { %p937_p11 = pneg %p936_p10 }
  0x3f   : > { %p942_p5 = pnand %p941_p3, %p937_p11 }
  0x41   : > { %945 = shalt.err (!%p942_p5)
}
  0x42   : > { %789 = dma.hbm_to_vmem [thread:$0]  (!%p1154_p2), %s221_s6, 256, %s223_s27, %s211_s9, %s1292_s24, %s1292_s24, %s1291_s20  }
  0x43   : > { %234 = sbr.rel (%p1113_p8) target bundleno = 1297 (0x511), region = 36  ;;  %s1196_s23 = sand.u32 (!%p1113_p8), 1, %s1031_s16  }
  0x44   : > { %s734_s3 = sshll.u32 (!%p1113_p8), %s1196_s23, 4  ;;  %s237_s0 = scalar_lea.sflag (!%p1113_p8), [#allocation3], %s1196_s23 }
  0x45   : > { %s240_s30 = scalar_lea.vmem (!%p1113_p8), [#allocation2], %s734_s3 }
  0x48   : > { %1006 = dma.done.wait (%p1100_p4), %s237_s0, 256  }
  0x49   : > { %1008 = vsyncadd (%p1100_p4), %s237_s0, 4294967040  ;;  %s246_s6 = sand.u32 1, %s1091_s19   ;;  %s1205_s26 = scalar_lea.vmem [#allocation5], %s734_s3 }
  0x4a   : > { %s247_s5 = scalar_lea.sflag [#allocation6], %s246_s6 }
  0x4b   : > { %1010 = dma.done.wait (%p1100_p4), %s247_s5, 256  }
  0x4c   : > { %1012 = vsyncadd (%p1100_p4), %s247_s5, 4294967040 }
  0x4d   : > { %1014 = dma.done.wait (%p45_p1), [#allocation6], 3072  }
  0x4e   : > { %1016 = vsyncadd (%p45_p1), [#allocation6], 4294964224 }
  0x4f   : > { %1018 = dma.done.wait (%p45_p1), [#allocation9], 128  }
  0x50   : > { %1020 = vsyncadd (%p45_p1), [#allocation9], 4294967168  ;;  %v298_v0 = vld [vmem:[#allocation7 + $0x18] sm:$0xff]  ;;  %v297_v1 = vld [vmem:[#allocation7 + $0x10] sm:$0xff]  ;;  %vm301_vm0 = vcmask 261120   ;;  %vm331_vm1 = vcmask 130048  }
  0x51   : > { %320 = vmatpush.msra.mxu0 %v298_v0  ;;  %v296_v2 = vld [vmem:[#allocation7 + $0x8] sm:$0xff]  ;;  %v295_v3 = vld [vmem:[#allocation7] sm:$0xff]  ;;  %v367_v6 = vld [vmem:[#allocation7 + $0x38] sm:$0xff]  ;;  %s738_s21 = sshll.u32 %s1196_s23, 3  ;;  %s757_s8 = sshll.u32 %s1091_s19, 3  ;;  %vm592_vm2 = vcmask 64512  }
  0x52   : > { %v291_v4 = vld [vmem:[%s240_s30] sm:$0xff]  ;;  %v292_v5 = vld [vmem:[%s240_s30 + $0x8] sm:$0xff]  ;;  %388 = vmatpush.msra.mxu2 %v367_v6  ;;  %s605_s12 = scalar_lea.hbm %s1275_s4, %s757_s8  ;;  %s290_s27 = scalar_lea.vmem [#allocation10], %s738_s21 }
  0x53   : > { %321 = vmatpush.msra.mxu0 %v297_v1  ;;  %v366_v7 = vld [vmem:[#allocation7 + $0x30] sm:$0xff]  ;;  %v836_v9 = vld [vmem:[#allocation8] ss:$0 sm:$0xff]  ;;  %v294_v14 = vld [vmem:[%s1205_s26 + $0x8] sm:$0xff]  ;;  %s607_s28 = sshll.u32 %s290_s27, 4  ;;  %s609_s9 = sshll.u32 %s605_s12, 4  ;;  %s608_s28 = int_to_ptr.vmem [resolvable:$true] %s607_s28  ;;  %s610_s9 = int_to_ptr.hbm [resolvable:$true] %s609_s9 }
  0x54   : > { %389 = vmatpush.msra.mxu2 %v366_v7  ;;  %v293_v13 = vld [vmem:[%s1205_s26] sm:$0xff]  ;;  %v365_v15 = vld [vmem:[#allocation7 + $0x28] sm:$0xff]  ;;  %v405_v17 = vld [vmem:[#allocation7 + $0x58] sm:$0xff]  ;;  %s595_s2 = scalar_lea.sflag [#allocation4], %s1196_s23  ;;  %s975_s25 = sshra.s32 %s610_s9, 4  ;;  %s976_s25 = int_to_ptr.hbm [resolvable:$true] %s975_s25 }
  0x55   : > { %322 = vmatpush.msra.mxu0 %v296_v2  ;;  %v364_v16 = vld [vmem:[#allocation7 + $0x20] sm:$0xff]  ;;  %426 = vmatpush.msra.mxu3 %v405_v17  ;;  %v404_v22 = vld [vmem:[#allocation7 + $0x50] sm:$0xff]  ;;  %v403_v23 = vld [vmem:[#allocation7 + $0x48] sm:$0xff]  ;;  %s977_s29 = scalar_lea.hbm %s976_s25, 8  ;;  %s981_s7 = scalar_lea.hbm %s1275_s4, 32 }
  0x56   : > { %390 = vmatpush.msra.mxu2 %v365_v15  ;;  %v402_v24 = vld [vmem:[#allocation7 + $0x40] sm:$0xff]  ;;  %v466_v32 = vld [vmem:[#allocation7 + $0x78] sm:$0xff]  ;;  %v465_v33 = vld [vmem:[#allocation7 + $0x70] sm:$0xff]  ;;  %p978_p1 = scmp.ne.s32.totalorder %s976_s25, %s977_s29  ;;  %p982_p2 = scmp.lt.s32.totalorder %s976_s25, %s1275_s4 }
  0x57   : > { %323 = vmatpush.msra.mxu0 %v295_v3  ;;  %427 = vmatpush.msra.mxu3 %v404_v22  ;;  %v837_v25 = vld [vmem:[#allocation8 + $0x1] ss:$0 sm:$0xff]  ;;  %v838_v35 = vld [vmem:[#allocation8 + $0x2] ss:$0 sm:$0xff]  ;;  %v464_v39 = vld [vmem:[#allocation7 + $0x68] sm:$0xff]  ;;  %p983_p9 = scmp.lt.s32.totalorder %s981_s7, %s977_s29 }
  0x58   : > { %739 = vmatmul.msk.f32.vlgmr.msra.gmra.mxu0 %vm301_vm0, %v291_v4  ;;  %391 = vmatpush.msra.mxu2 %v364_v16  ;;  %v463_v40 = vld [vmem:[#allocation7 + $0x60] sm:$0xff]  ;;  %v504_v41 = vld [vmem:[#allocation7 + $0x98] sm:$0xff]  ;;  %v503_v46 = vld [vmem:[#allocation7 + $0x90] sm:$0xff]  ;;  %p979_p4 = pnand %p978_p1, %p1138_p0 }
  0x59   : > { %428 = vmatpush.msra.mxu3 %v403_v23  ;;  %487 = vmatpush.msrb.mxu0 %v466_v32  ;;  %v502_v47 = vld [vmem:[#allocation7 + $0x88] sm:$0xff]  ;;  %v501_v48 = vld [vmem:[#allocation7 + $0x80] sm:$0xff]  ;;  %v542_v49 = vld [vmem:[#allocation7 + $0xb8] sm:$0xff]  ;;  %p984_p7 = por %p983_p9, %p982_p2 }
  0x5a   : > { %525 = vmatpush.msrb.mxu2 %v504_v41  ;;  %v839_v50 = vld [vmem:[#allocation8 + $0x3] ss:$0 sm:$0xff]  ;;  %v541_v57 = vld [vmem:[#allocation7 + $0xb0] sm:$0xff]  ;;  %v540_v58 = vld [vmem:[#allocation7 + $0xa8] sm:$0xff]  ;;  %p980_p8 = pneg %p979_p4 }
  0x5b   : > { %429 = vmatpush.msra.mxu3 %v402_v24  ;;  %488 = vmatpush.msrb.mxu0 %v465_v33  ;;  %v539_v59 = vld [vmem:[#allocation7 + $0xa0] sm:$0xff] }
  0x5c   : > { %526 = vmatpush.msrb.mxu2 %v503_v46  ;;  %v840_v60 = vld [vmem:[#allocation8 + $0x4] ss:$0 sm:$0xff]  ;;  %p985_p10 = pnand %p984_p7, %p980_p8 }
  0x5d   : > { %489 = vmatpush.msrb.mxu0 %v464_v39  ;;  %558 = vmatpush.msrb.mxu3 %v542_v49 }
  0x5e   : > { %527 = vmatpush.msrb.mxu2 %v502_v47 }
  0x5f   : > { %490 = vmatpush.msrb.mxu0 %v463_v40  ;;  %559 = vmatpush.msrb.mxu3 %v541_v57 }
  0x60   : > { %740 = vmatmul.msk.f32.gmra.mxu0 %vm301_vm0, %v292_v5  ;;  %528 = vmatpush.msrb.mxu2 %v501_v48 }
  0x61   : > { %560 = vmatpush.msrb.mxu3 %v540_v58 }
  0x63   : > { %561 = vmatpush.msrb.mxu3 %v539_v59 }
  0xd5   : > { %v325_v8 = vpop.f32.mrf.mxu0 }
  0xd6   : > { %v326_v12 = vadd.f32 %v836_v9, %v325_v8 }
  0xdd   : > { %v328_v10 = vpop.f32.mrf.mxu0 }
  0xde   : > { %v329_v11 = vadd.f32 %v836_v9, %v328_v10 }
  0xe0   : > { %352 = vmatpush.msra.mxu1 %v329_v11 }
  0xe2   : > { %353 = vmatpush.msra.mxu1 %v326_v12 }
  0xe3   : > { %741 = vmatmul.msk.f32.vlgmr.msra.gmra.mxu1 %vm331_vm1, %v293_v13 }
  0xeb   : > { %742 = vmatmul.msk.f32.gmra.mxu1 %vm331_vm1, %v294_v14 }
 0x160   : > { %v355_v18 = vpop.f32.mrf.mxu1 }
 0x161   : > { %v361_v19 = vadd.f32 %v355_v18, %v326_v12 }
 0x163   : > { %743 = vmatmul.msk.f32.vlgmr.msra.gmra.mxu2 %vm301_vm0, %v361_v19 }
 0x168   : > { %v358_v20 = vpop.f32.mrf.mxu1 }
 0x169   : > { %v362_v21 = vadd.f32 %v358_v20, %v329_v11 }
 0x16b   : > { %744 = vmatmul.msk.f32.gmra.mxu2 %vm301_vm0, %v362_v21 }
 0x1e6   : > { %v393_v26 = vpop.f32.mrf.mxu2 }
 0x1e7   : > { %v394_v27 = vadd.f32 %v837_v25, %v393_v26 }
 0x1e9   : > { %v399_v28 = vmax.f32 %v394_v27, 0.0 }
 0x1eb   : > { %745 = vmatmul.msk.f32.vlgmr.msra.gmra.mxu3 %vm301_vm0, %v399_v28 }
 0x1ee   : > { %v396_v29 = vpop.f32.mrf.mxu2 }
 0x1ef   : > { %v397_v30 = vadd.f32 %v837_v25, %v396_v29 }
 0x1f1   : > { %v400_v31 = vmax.f32 %v397_v30, 0.0 }
 0x1f3   : > { %746 = vmatmul.msk.f32.gmra.mxu3 %vm301_vm0, %v400_v31 }
 0x26e   : > { %v431_v34 = vpop.f32.mrf.mxu3 }
 0x26f   : > { %v432_v38 = vadd.f32 %v838_v35, %v431_v34 }
 0x276   : > { %v434_v36 = vpop.f32.mrf.mxu3 }
 0x277   : > { %v435_v37 = vadd.f32 %v838_v35, %v434_v36 }
 0x279   : > { %451 = vmatpush.msrb.mxu1 %v435_v37 }
 0x27b   : > { %452 = vmatpush.msrb.mxu1 %v432_v38 }
 0x27c   : > { %747 = vmatmul.msk.f32.vlgmr.msrb.gmra.mxu1 %vm331_vm1, %v293_v13 }
 0x284   : > { %748 = vmatmul.msk.f32.gmra.mxu1 %vm331_vm1, %v294_v14 }
 0x2f9   : > { %v454_v42 = vpop.f32.mrf.mxu1 }
 0x2fa   : > { %v460_v43 = vadd.f32 %v454_v42, %v432_v38 }
 0x2fc   : > { %749 = vmatmul.msk.f32.vlgmr.msrb.gmra.mxu0 %vm301_vm0, %v460_v43 }
 0x301   : > { %v457_v44 = vpop.f32.mrf.mxu1 }
 0x302   : > { %v461_v45 = vadd.f32 %v457_v44, %v435_v37 }
 0x304   : > { %750 = vmatmul.msk.f32.gmra.mxu0 %vm301_vm0, %v461_v45 }
 0x379   : > { %v492_v51 = vpop.f32.mrf.mxu0 }
 0x37a   : > { %v493_v52 = vadd.f32 %v839_v50, %v492_v51 }
 0x37c   : > { %v498_v53 = vmax.f32 %v493_v52, 0.0 }
 0x37e   : > { %751 = vmatmul.msk.f32.vlgmr.msrb.gmra.mxu2 %vm301_vm0, %v498_v53 }
 0x381   : > { %v495_v54 = vpop.f32.mrf.mxu0 }
 0x382   : > { %v496_v55 = vadd.f32 %v839_v50, %v495_v54 }
 0x384   : > { %v499_v56 = vmax.f32 %v496_v55, 0.0 }
 0x386   : > { %752 = vmatmul.msk.f32.gmra.mxu2 %vm301_vm0, %v499_v56 }
 0x401   : > { %v530_v61 = vpop.f32.mrf.mxu2 }
 0x402   : > { %v531_v62 = vadd.f32 %v840_v60, %v530_v61 }
 0x404   : > { %v536_v63 = vmax.f32 %v531_v62, 0.0 }
 0x406   : > { %753 = vmatmul.msk.f32.vlgmr.msrb.gmra.mxu3 %vm301_vm0, %v536_v63 }
 0x409   : > { %v533_v0 = vpop.f32.mrf.mxu2 }
 0x40a   : > { %v534_v1 = vadd.f32 %v840_v60, %v533_v0 }
 0x40c   : > { %v537_v2 = vmax.f32 %v534_v1, 0.0 }
 0x40e   : > { %754 = vmatpush.xpose.msk.msra.mxu3 %vm301_vm0, %v537_v2 }
 0x489   : > { %v563_v3 = vpop.f32.mrf.mxu3 }
 0x48a   : > { %755 = vmatmul.msk.f32.vlgmr.msra.gmra.mxu3 %vm301_vm0, %v563_v3 }
 0x50d   : > { %v589_v4 = vpop.f32.mrf.mxu3 }
 0x50e   : > { %593 = vst.msk [vmem:[%s290_s27] sm:$0xff] %vm592_vm2, %v589_v4 }
 0x50f   : > { %988 = shalt.err (!%p985_p10)
}
 0x510   : > { %774 = dma.vmem_to_hbm [thread:$0]  (%p1138_p0), %s608_s28, 128, %s610_s9, %s595_s2  }
 0x511 PF: > { %p799_p11 = scmp.ge.s32.totalorder %s1039_s18, 2  ;;  %s621_s23 = sand.u32 1, %s1027_s15  }
 0x512   : > { %s622_s30 = scalar_lea.sflag [#allocation4], %s621_s23 }
 0x513   : > { %p791_p12 = pnand %p799_p11, %p1105_p6 }
 0x515   : > { %p792_p13 = pneg %p791_p12 }
 0x517   : > { %1022 = dma.done.wait (%p792_p13), %s622_s30, 128  }
 0x518   : > { %1024 = vsyncadd (%p792_p13), %s622_s30, 4294967168  ;;  %p21_p3 = scmp.ge.s32.totalorder %s1128_s10, 6   ;;  %s1293_s15 = smov %s1031_s16 }
 0x519   : > { %s1294_s16 = smov %s1035_s17  ;;  %s1295_s17 = smov %s1144_s14 }
 0x51a   : > { %s1296_s18 = smov %s1128_s10  ;;  %23 = sbr.rel (!%p21_p3) target bundleno = 12 (0xc), region = 107 }
 0x51f   :  { %628 = vsyncpa [#allocation3], 1 }
 0x520   :  { %630 = vsyncpa [#allocation3 + $0x1], 1 }
 0x521   :  { %631 = vsyncpa [#allocation6], 1 }
 0x522   :  { %633 = vsyncpa [#allocation6 + $0x1], 1 }
 0x523   :  { %634 = vsyncpa [#allocation9], 1 }
 0x524   :  { %635 = vsyncpa [#allocation4], 1 }
 0x525   :  { %637 = vsyncpa [#allocation4 + $0x1], 1 }

</bundles_post_ra>
